<compile_context>
chip_gen: v5e
topology: v5e:2x2
jax: 0.10.0
libtpu: 0.0.40
codegen_flags: <defaults>
</compile_context>

<pallas_src>
import jax
import jax.numpy as jnp
from jax.experimental import pallas as pl
from jax.experimental.pallas import tpu as pltpu

IN_FEATURES = 4
OUT_FEATURES = 3
LANES = 128
SUBTILE = LANES * 8          # 1024 rows: keeps the sublane dim a multiple of 8
TB_MAX = 131072              # max batch rows per tile (2 MiB x + 1.5 MiB out)


def linear_kernel(w_ref, b_ref, x_ref, o_ref):
    # w_ref: (OUT, IN)        f32 SMEM   (PyTorch weight layout)
    # b_ref: (1, OUT)         f32 SMEM
    # x_ref: (IN, ts, 128)    f32 VMEM   (batch dense on sublanes + lanes)
    # o_ref: (OUT, ts, 128)   f32 VMEM
    xs = [x_ref[k] for k in range(IN_FEATURES)]          # each (ts, 128) slab
    for j in range(OUT_FEATURES):
        # Fold the bias into the first FMA (no separate broadcast per j).
        acc = xs[0] * w_ref[j, 0] + b_ref[0, j]
        for k in range(1, IN_FEATURES):
            acc = acc + w_ref[j, k] * xs[k]               # VPU FMA chain
        o_ref[j] = acc.astype(o_ref.dtype)                # full-sublane store


def _choose_tiling(batch):
    """Pick (n_tiles, tile_rows): tiles first, then (8*128)-aligned size."""
    # >= 2 tiles whenever worthwhile so v7x's two TensorCores both get work.
    min_tiles = 2 if batch > SUBTILE else 1
    n_tiles = max(pl.cdiv(batch, TB_MAX), min_tiles)
    if n_tiles == 1:
        tb = pl.cdiv(batch, LANES) * LANES        # single tile == full array
    else:
        tb = pl.cdiv(pl.cdiv(batch, n_tiles), SUBTILE) * SUBTILE
        n_tiles = pl.cdiv(batch, tb)              # re-derive: no empty tiles
        if n_tiles == 1:
            tb = pl.cdiv(batch, LANES) * LANES
    return n_tiles, tb


def linear_forward_features_major(xt, weight, bias):
    """Copy-free path. xt: (4, B) features-major -> (3, B) features-major."""
    B = xt.shape[1]
    n_tiles, tb = _choose_tiling(B)
    Bp = n_tiles * tb
    if Bp != B:
        # Alignment pad only (<= ~1024*n_tiles rows), not a whole tile.
        xt = jnp.pad(xt, ((0, 0), (0, Bp - B)))
    ts = tb // LANES
    x3 = xt.reshape(IN_FEATURES, Bp // LANES, LANES)      # free: contiguous
    b2d = bias.reshape(1, OUT_FEATURES)

    out3 = pl.pallas_call(
        linear_kernel,
        out_shape=jax.ShapeDtypeStruct((OUT_FEATURES, Bp // LANES, LANES),
                                       xt.dtype),
        grid_spec=pltpu.PrefetchScalarGridSpec(
            num_scalar_prefetch=0,
            grid=(n_tiles,),
            in_specs=[
                pl.BlockSpec(memory_space=pltpu.MemorySpace.SMEM),   # weight
                pl.BlockSpec(memory_space=pltpu.MemorySpace.SMEM),   # bias
                pl.BlockSpec((IN_FEATURES, ts, LANES),
                             lambda i: (0, i, 0)),                    # x^T tile
            ],
            out_specs=pl.BlockSpec((OUT_FEATURES, ts, LANES),
                                   lambda i: (0, i, 0)),
        ),
        compiler_params=pltpu.CompilerParams(
            dimension_semantics=("parallel",)),   # batch tiles are independent
    )(weight, b2d, x3)

    out_t = out3.reshape(OUT_FEATURES, Bp)                # free: contiguous
    return out_t[:, :B]


def linear_forward(x, weight, bias):
    """Drop-in (B, 4) -> (B, 3) matching the PyTorch module's forward.

    The two transposes here are boundary layout-plumbing; a features-major
    producer/consumer should call `linear_forward_features_major` directly.
    """
    return linear_forward_features_major(x.T, weight, bias).T


if __name__ == "__main__":
    key = jax.random.PRNGKey(0)
    kx, kw, kb = jax.random.split(key, 3)

    # Deterministic synthetic parameters (same shapes as nn.Linear(4, 3)),
    # mimicking PyTorch's default uniform(-1/sqrt(fan_in), 1/sqrt(fan_in)).
    bound = 1.0 / jnp.sqrt(jnp.float32(IN_FEATURES))
    weight = jax.random.uniform(kw, (OUT_FEATURES, IN_FEATURES),
                                minval=-bound, maxval=bound, dtype=jnp.float32)
    bias = jax.random.uniform(kb, (OUT_FEATURES,),
                              minval=-bound, maxval=bound, dtype=jnp.float32)

    # Small primary check (single tile).
    batch = 8
    x = jax.random.normal(kx, (batch, IN_FEATURES), dtype=jnp.float32)
    out = jax.block_until_ready(linear_forward(x, weight, bias))
    ref = x @ weight.T + bias
    assert out.shape == (batch, OUT_FEATURES)
    assert jnp.allclose(out, ref, atol=1e-5, rtol=1e-5)

    # Ragged multi-tile check (exercises the 2-tile v7x path + alignment pad).
    batch2 = 2304
    x2 = jax.random.normal(kx, (batch2, IN_FEATURES), dtype=jnp.float32)
    out2 = jax.block_until_ready(linear_forward(x2, weight, bias))
    ref2 = x2 @ weight.T + bias
    assert out2.shape == (batch2, OUT_FEATURES)
    assert jnp.allclose(out2, ref2, atol=1e-5, rtol=1e-5)

    print("KERNEL_OK")
</pallas_src>

<mosaic_0001>
module attributes {stable_mosaic.version = 11 : i64} {
  func.func @linear_kernel(%arg0: i32, %arg1: memref<3x4xf32, #tpu.memory_space<smem>>, %arg2: memref<1x3xf32, #tpu.memory_space<smem>>, %arg3: memref<4x1x128xf32, #tpu.memory_space<vmem>>, %arg4: memref<3x1x128xf32, #tpu.memory_space<vmem>>) attributes {dimension_semantics = [#tpu.dimension_semantics<parallel>], iteration_bounds = array<i64: 1>, scalar_prefetch = 0 : i64, scratch_operands = 0 : i64, tpu.core_type = #tpu.core_type<tc>, window_params = [{transform_indices = @transform_0, window_bounds = array<i64: 3, 4>}, {transform_indices = @transform_1, window_bounds = array<i64: 1, 3>}, {transform_indices = @transform_2, window_bounds = array<i64: 4, 1, 128>}, {transform_indices = @transform_3, window_bounds = array<i64: 3, 1, 128>}]} {
    %c0 = arith.constant 0 : index
    %c0_0 = arith.constant 0 : index
    %c0_1 = arith.constant 0 : index
    %0 = vector.load %arg3[%c0, %c0_0, %c0_1] : memref<4x1x128xf32, #tpu.memory_space<vmem>>, vector<1x1x128xf32>
    %1 = vector.shape_cast %0 : vector<1x1x128xf32> to vector<1x128xf32>
    %c1 = arith.constant 1 : index
    %c0_2 = arith.constant 0 : index
    %c0_3 = arith.constant 0 : index
    %2 = vector.load %arg3[%c1, %c0_2, %c0_3] : memref<4x1x128xf32, #tpu.memory_space<vmem>>, vector<1x1x128xf32>
    %3 = vector.shape_cast %2 : vector<1x1x128xf32> to vector<1x128xf32>
    %c2 = arith.constant 2 : index
    %c0_4 = arith.constant 0 : index
    %c0_5 = arith.constant 0 : index
    %4 = vector.load %arg3[%c2, %c0_4, %c0_5] : memref<4x1x128xf32, #tpu.memory_space<vmem>>, vector<1x1x128xf32>
    %5 = vector.shape_cast %4 : vector<1x1x128xf32> to vector<1x128xf32>
    %c3 = arith.constant 3 : index
    %c0_6 = arith.constant 0 : index
    %c0_7 = arith.constant 0 : index
    %6 = vector.load %arg3[%c3, %c0_6, %c0_7] : memref<4x1x128xf32, #tpu.memory_space<vmem>>, vector<1x1x128xf32>
    %7 = vector.shape_cast %6 : vector<1x1x128xf32> to vector<1x128xf32>
    %c0_8 = arith.constant 0 : index
    %c0_9 = arith.constant 0 : index
    %8 = memref.load %arg1[%c0_8, %c0_9] : memref<3x4xf32, #tpu.memory_space<smem>>
    %9 = vector.broadcast %8 : f32 to vector<1x128xf32>
    %10 = arith.mulf %1, %9 : vector<1x128xf32>
    %c0_10 = arith.constant 0 : index
    %c0_11 = arith.constant 0 : index
    %11 = memref.load %arg2[%c0_10, %c0_11] : memref<1x3xf32, #tpu.memory_space<smem>>
    %12 = vector.broadcast %11 : f32 to vector<1x128xf32>
    %13 = arith.addf %10, %12 : vector<1x128xf32>
    %c0_12 = arith.constant 0 : index
    %c1_13 = arith.constant 1 : index
    %14 = memref.load %arg1[%c0_12, %c1_13] : memref<3x4xf32, #tpu.memory_space<smem>>
    %15 = vector.broadcast %14 : f32 to vector<1x128xf32>
    %16 = arith.mulf %15, %3 : vector<1x128xf32>
    %17 = arith.addf %13, %16 : vector<1x128xf32>
    %c0_14 = arith.constant 0 : index
    %c2_15 = arith.constant 2 : index
    %18 = memref.load %arg1[%c0_14, %c2_15] : memref<3x4xf32, #tpu.memory_space<smem>>
    %19 = vector.broadcast %18 : f32 to vector<1x128xf32>
    %20 = arith.mulf %19, %5 : vector<1x128xf32>
    %21 = arith.addf %17, %20 : vector<1x128xf32>
    %c0_16 = arith.constant 0 : index
    %c3_17 = arith.constant 3 : index
    %22 = memref.load %arg1[%c0_16, %c3_17] : memref<3x4xf32, #tpu.memory_space<smem>>
    %23 = vector.broadcast %22 : f32 to vector<1x128xf32>
    %24 = arith.mulf %23, %7 : vector<1x128xf32>
    %25 = arith.addf %21, %24 : vector<1x128xf32>
    %c0_18 = arith.constant 0 : index
    %c0_19 = arith.constant 0 : index
    %c0_20 = arith.constant 0 : index
    %26 = vector.load %arg4[%c0_18, %c0_19, %c0_20] : memref<3x1x128xf32, #tpu.memory_space<vmem>>, vector<1x1x128xf32>
    %27 = vector.shape_cast %26 : vector<1x1x128xf32> to vector<1x128xf32>
    %28 = vector.shape_cast %25 : vector<1x128xf32> to vector<1x1x128xf32>
    tpu.vector_store %arg4[%c0_18, %c0_19, %c0_20], %28 {strides = array<i32>} : memref<3x1x128xf32, #tpu.memory_space<vmem>>, vector<1x1x128xf32>,
    %c1_21 = arith.constant 1 : index
    %c0_22 = arith.constant 0 : index
    %29 = memref.load %arg1[%c1_21, %c0_22] : memref<3x4xf32, #tpu.memory_space<smem>>
    %30 = vector.broadcast %29 : f32 to vector<1x128xf32>
    %31 = arith.mulf %1, %30 : vector<1x128xf32>
    %c0_23 = arith.constant 0 : index
    %c1_24 = arith.constant 1 : index
    %32 = memref.load %arg2[%c0_23, %c1_24] : memref<1x3xf32, #tpu.memory_space<smem>>
    %33 = vector.broadcast %32 : f32 to vector<1x128xf32>
    %34 = arith.addf %31, %33 : vector<1x128xf32>
    %c1_25 = arith.constant 1 : index
    %c1_26 = arith.constant 1 : index
    %35 = memref.load %arg1[%c1_25, %c1_26] : memref<3x4xf32, #tpu.memory_space<smem>>
    %36 = vector.broadcast %35 : f32 to vector<1x128xf32>
    %37 = arith.mulf %36, %3 : vector<1x128xf32>
    %38 = arith.addf %34, %37 : vector<1x128xf32>
    %c1_27 = arith.constant 1 : index
    %c2_28 = arith.constant 2 : index
    %39 = memref.load %arg1[%c1_27, %c2_28] : memref<3x4xf32, #tpu.memory_space<smem>>
    %40 = vector.broadcast %39 : f32 to vector<1x128xf32>
    %41 = arith.mulf %40, %5 : vector<1x128xf32>
    %42 = arith.addf %38, %41 : vector<1x128xf32>
    %c1_29 = arith.constant 1 : index
    %c3_30 = arith.constant 3 : index
    %43 = memref.load %arg1[%c1_29, %c3_30] : memref<3x4xf32, #tpu.memory_space<smem>>
    %44 = vector.broadcast %43 : f32 to vector<1x128xf32>
    %45 = arith.mulf %44, %7 : vector<1x128xf32>
    %46 = arith.addf %42, %45 : vector<1x128xf32>
    %c1_31 = arith.constant 1 : index
    %c0_32 = arith.constant 0 : index
    %c0_33 = arith.constant 0 : index
    %47 = vector.load %arg4[%c1_31, %c0_32, %c0_33] : memref<3x1x128xf32, #tpu.memory_space<vmem>>, vector<1x1x128xf32>
    %48 = vector.shape_cast %47 : vector<1x1x128xf32> to vector<1x128xf32>
    %49 = vector.shape_cast %46 : vector<1x128xf32> to vector<1x1x128xf32>
    tpu.vector_store %arg4[%c1_31, %c0_32, %c0_33], %49 {strides = array<i32>} : memref<3x1x128xf32, #tpu.memory_space<vmem>>, vector<1x1x128xf32>,
    %c2_34 = arith.constant 2 : index
    %c0_35 = arith.constant 0 : index
    %50 = memref.load %arg1[%c2_34, %c0_35] : memref<3x4xf32, #tpu.memory_space<smem>>
    %51 = vector.broadcast %50 : f32 to vector<1x128xf32>
    %52 = arith.mulf %1, %51 : vector<1x128xf32>
    %c0_36 = arith.constant 0 : index
    %c2_37 = arith.constant 2 : index
    %53 = memref.load %arg2[%c0_36, %c2_37] : memref<1x3xf32, #tpu.memory_space<smem>>
    %54 = vector.broadcast %53 : f32 to vector<1x128xf32>
    %55 = arith.addf %52, %54 : vector<1x128xf32>
    %c2_38 = arith.constant 2 : index
    %c1_39 = arith.constant 1 : index
    %56 = memref.load %arg1[%c2_38, %c1_39] : memref<3x4xf32, #tpu.memory_space<smem>>
    %57 = vector.broadcast %56 : f32 to vector<1x128xf32>
    %58 = arith.mulf %57, %3 : vector<1x128xf32>
    %59 = arith.addf %55, %58 : vector<1x128xf32>
    %c2_40 = arith.constant 2 : index
    %c2_41 = arith.constant 2 : index
    %60 = memref.load %arg1[%c2_40, %c2_41] : memref<3x4xf32, #tpu.memory_space<smem>>
    %61 = vector.broadcast %60 : f32 to vector<1x128xf32>
    %62 = arith.mulf %61, %5 : vector<1x128xf32>
    %63 = arith.addf %59, %62 : vector<1x128xf32>
    %c2_42 = arith.constant 2 : index
    %c3_43 = arith.constant 3 : index
    %64 = memref.load %arg1[%c2_42, %c3_43] : memref<3x4xf32, #tpu.memory_space<smem>>
    %65 = vector.broadcast %64 : f32 to vector<1x128xf32>
    %66 = arith.mulf %65, %7 : vector<1x128xf32>
    %67 = arith.addf %63, %66 : vector<1x128xf32>
    %c2_44 = arith.constant 2 : index
    %c0_45 = arith.constant 0 : index
    %c0_46 = arith.constant 0 : index
    %68 = vector.load %arg4[%c2_44, %c0_45, %c0_46] : memref<3x1x128xf32, #tpu.memory_space<vmem>>, vector<1x1x128xf32>
    %69 = vector.shape_cast %68 : vector<1x1x128xf32> to vector<1x128xf32>
    %70 = vector.shape_cast %67 : vector<1x128xf32> to vector<1x1x128xf32>
    tpu.vector_store %arg4[%c2_44, %c0_45, %c0_46], %70 {strides = array<i32>} : memref<3x1x128xf32, #tpu.memory_space<vmem>>, vector<1x1x128xf32>,
    return
  }
  func.func @transform_0(%arg0: i32) -> (i32, i32) {
    %c0_i32 = arith.constant 0 : i32
    %c0_i32_0 = arith.constant 0 : i32
    %c0_i32_1 = arith.constant 0 : i32
    return %c0_i32, %c0_i32_0 : i32, i32
  }
  func.func @transform_1(%arg0: i32) -> (i32, i32) {
    %c0_i32 = arith.constant 0 : i32
    %c0_i32_0 = arith.constant 0 : i32
    %c0_i32_1 = arith.constant 0 : i32
    return %c0_i32, %c0_i32_0 : i32, i32
  }
  func.func @transform_2(%arg0: i32) -> (i32, i32, i32) {
    %c0_i32 = arith.constant 0 : i32
    %c0_i32_0 = arith.constant 0 : i32
    %c0_i32_1 = arith.constant 0 : i32
    return %c0_i32, %arg0, %c0_i32_0 : i32, i32, i32
  }
  func.func @transform_3(%arg0: i32) -> (i32, i32, i32) {
    %c0_i32 = arith.constant 0 : i32
    %c0_i32_0 = arith.constant 0 : i32
    %c0_i32_1 = arith.constant 0 : i32
    return %c0_i32, %arg0, %c0_i32_0 : i32, i32, i32
  }
}

</mosaic_0001>

<bundles_post_ra>
// kernel: tpu_custom_call.1
= control target key start
LH: loop header
LB: loop body
LE: loop exit
PB: predicated region body
PF: predicated region fallthrough
CT: control target
= control target key end

     0   :  { %8 = vsyncpa [#allocation5], 0  ;;  %s286_s0 = inlined_call_operand.hbm [shape: f32[3,4], index: 0, kind: input, shape index: {}]   ;;  %s287_s1 = inlined_call_operand.hbm [shape: f32[1,3], index: 1, kind: input, shape index: {}]   ;;  %s288_s2 = inlined_call_operand.hbm [shape: f32[4,1,128], index: 2, kind: input, shape index: {}]   ;;  %s289_s3 = inlined_call_operand.hbm [shape: f32[3,1,128], index: 3, kind: output, shape index: {}]  }
   0x1   :  { %9 = vsyncpa [#allocation7], 0 }
   0x2   :  { %10 = vsyncpa [#allocation3], 0 }
   0x3   :  { %11 = vsyncpa [#allocation4], 0  ;;  %s17_s14 = sshll.u32 %s286_s0, 4  ;;  %s26_s17 = sshll.u32 %s287_s1, 4  ;;  %s18_s14 = int_to_ptr.hbm [resolvable:$true] %s17_s14  ;;  %s27_s17 = int_to_ptr.hbm [resolvable:$true] %s26_s17 }
   0x4   :  { %s242_s18 = smov [#allocation2]   ;;  %s243_s19 = smov [#allocation6]  }
   0x5   :  { %20 = dma.hbm_to_smem %s18_s14, 64, %s242_s18, [#allocation5]  }
   0x6   :  { %29 = dma.hbm_to_smem %s27_s17, 16, %s243_s19, [#allocation7]  }
   0x7   :  { %s34_s22 = sshll.u32 %s288_s2, 4  ;;  %s244_s23 = smov [#allocation8]   ;;  %s35_s22 = int_to_ptr.hbm [resolvable:$true] %s34_s22 }
   0x8   :  { %s36_s24 = sshll.u32 %s244_s23, 4  ;;  %s245_s25 = smov 16   ;;  %s37_s24 = int_to_ptr.vmem [resolvable:$true] %s36_s24 }
   0x9   :  { %s246_s0 = smov 1  }
   0xa   :  { %42 = dma.hbm_to_vmem [thread:$0]  %s35_s22, 64, %s37_s24, [#allocation3], %s245_s25, %s245_s25, %s246_s0  }
   0xb   :  { %234 = dma.done.wait [#allocation5], 64  }
   0xc   :  { %235 = vsyncadd [#allocation5], 4294967232 }
   0xd   :  { %236 = dma.done.wait [#allocation7], 16  }
   0xe   :  { %237 = vsyncadd [#allocation7], 4294967280 }
   0xf   :  { %238 = dma.done.wait [#allocation3], 64  }
  0x10   :  { %239 = vsyncadd [#allocation3], 4294967232 }
  0x11   :  { %55 = sfence }
  0x12   :  { %s63_s1 = sld [smem:[#allocation2]]  ;;  %v56_v0 = vld [vmem:[#allocation8] sm:$0x1]  ;;  %v58_v1 = vld [vmem:[#allocation8 + $0x1] sm:$0x1]  ;;  %s247_s12 = smov [#allocation9]  }
  0x13   :  { %s66_s26 = sld [smem:[#allocation6]]  ;;  %v60_v3 = vld [vmem:[#allocation8 + $0x2] sm:$0x1]  ;;  %v62_v6 = vld [vmem:[#allocation8 + $0x3] sm:$0x1]  ;;  %s126_s13 = sshll.u32 %s247_s12, 4  ;;  %s127_s13 = int_to_ptr.vmem [resolvable:$true] %s126_s13 }
  0x14   :  { %s143_s2 = sld [smem:[#allocation2 + $0x1]]  ;;  %s128_s16 = sshll.u32 %s289_s3, 4  ;;  %s129_s16 = int_to_ptr.hbm [resolvable:$true] %s128_s16 }
  0x15   :  { %s144_s27 = sld [smem:[#allocation2 + $0x2]] }
  0x16   :  { %s145_s28 = sld [smem:[#allocation2 + $0x3]] }
  0x17   :  { %s146_s29 = sld [smem:[#allocation2 + $0x80]] }
  0x18   :  { %v64_v2 = vstv %s63_s1  ;;  %s147_s30 = sld [smem:[#allocation6 + $0x1]] }
  0x19   :  { %v65_v4 = vmul.f32 %v64_v2, %v56_v0  ;;  %v67_v5 = vstv %s66_s26  ;;  %s148_s4 = sld [smem:[#allocation2 + $0x81]] }
  0x1a   :  { %v70_v7 = vstv %s143_s2  ;;  %s149_s5 = sld [smem:[#allocation2 + $0x82]] }
  0x1b   :  { %v68_v8 = vadd.f32 %v67_v5, %v65_v4  ;;  %v71_v9 = vmul.f32 %v70_v7, %v58_v1  ;;  %v74_v10 = vstv %s144_s27  ;;  %s150_s6 = sld [smem:[#allocation2 + $0x83]] }
  0x1c   :  { %v75_v11 = vmul.f32 %v74_v10, %v60_v3  ;;  %v78_v12 = vstv %s145_s28  ;;  %s151_s7 = sld [smem:[#allocation2 + $0x100]] }
  0x1d   :  { %v72_v13 = vadd.f32 %v71_v9, %v68_v8  ;;  %v79_v14 = vmul.f32 %v78_v12, %v62_v6  ;;  %v83_v15 = vstv %s146_s29  ;;  %s152_s8 = sld [smem:[#allocation6 + $0x2]] }
  0x1e   :  { %v84_v16 = vmul.f32 %v83_v15, %v56_v0  ;;  %v86_v17 = vstv %s147_s30  ;;  %s153_s9 = sld [smem:[#allocation2 + $0x101]] }
  0x1f   :  { %v76_v18 = vadd.f32 %v75_v11, %v72_v13  ;;  %v89_v19 = vstv %s148_s4  ;;  %s154_s10 = sld [smem:[#allocation2 + $0x102]] }
  0x20   :  { %v87_v20 = vadd.f32 %v86_v17, %v84_v16  ;;  %v90_v21 = vmul.f32 %v89_v19, %v58_v1  ;;  %v93_v22 = vstv %s149_s5  ;;  %s155_s11 = sld [smem:[#allocation2 + $0x103]] }
  0x21   :  { %v80_v23 = vadd.f32 %v79_v14, %v76_v18  ;;  %v94_v24 = vmul.f32 %v93_v22, %v60_v3  ;;  %v97_v25 = vstv %s150_s6 }
  0x22   :  { %v91_v26 = vadd.f32 %v90_v21, %v87_v20  ;;  %v98_v27 = vmul.f32 %v97_v25, %v62_v6  ;;  %v103_v28 = vstv %s151_s7 }
  0x23   :  { %81 = vst [vmem:[#allocation9] sm:$0x1] %v80_v23  ;;  %v104_v29 = vmul.f32 %v103_v28, %v56_v0  ;;  %v106_v30 = vstv %s152_s8 }
  0x24   :  { %v95_v31 = vadd.f32 %v94_v24, %v91_v26  ;;  %v109_v32 = vstv %s153_s9 }
  0x25   :  { %v107_v33 = vadd.f32 %v106_v30, %v104_v29  ;;  %v110_v34 = vmul.f32 %v109_v32, %v58_v1  ;;  %v113_v35 = vstv %s154_s10 }
  0x26   :  { %v99_v36 = vadd.f32 %v98_v27, %v95_v31  ;;  %v114_v37 = vmul.f32 %v113_v35, %v60_v3  ;;  %v117_v38 = vstv %s155_s11 }
  0x27   :  { %v111_v39 = vadd.f32 %v110_v34, %v107_v33  ;;  %v118_v40 = vmul.f32 %v117_v38, %v62_v6 }
  0x28   :  { %101 = vst [vmem:[#allocation9 + $0x1] sm:$0x1] %v99_v36 }
  0x29   :  { %v115_v41 = vadd.f32 %v114_v37, %v111_v39 }
  0x2b   :  { %v119_v42 = vadd.f32 %v118_v40, %v115_v41 }
  0x2d   :  { %121 = vst [vmem:[#allocation9 + $0x2] sm:$0x1] %v119_v42 }
  0x2e   :  { %134 = dma.vmem_to_hbm [thread:$0]  %s127_s13, 48, %s129_s16, [#allocation4], %s245_s25, %s245_s25, %s246_s0  }
  0x2f   :  { %240 = dma.done.wait [#allocation4], 48  }
  0x30   :  { %241 = vsyncadd [#allocation4], 4294967248 }
  0x31   :  { %139 = vsyncpa [#allocation3], 1 }
  0x32   :  { %140 = vsyncpa [#allocation4], 1 }
  0x33   :  { %141 = vsyncpa [#allocation5], 1 }
  0x34   :  { %142 = vsyncpa [#allocation7], 1 }

</bundles_post_ra>
